<compile_context>
chip_gen: v7x
topology: tpu7x:2x2x1
jax: 0.10.0
libtpu: 0.0.40
codegen_flags: <defaults>
</compile_context>

<pallas_src>
import functools

import jax
import jax.numpy as jnp
from jax.experimental import pallas as pl
from jax.experimental.pallas import tpu as pltpu

LN_EPS = 1e-12


def _encoder_kernel(x_ref, w1_ref, w2_ref, p_ref, o_ref):
    params = p_ref[...].astype(jnp.float32)            # (4, D)
    b1 = params[0:1, :]
    b2 = params[1:2, :]
    gamma = params[2:3, :]
    beta = params[3:4, :]

    # FC1 + ReLU: x block arrives as f32 straight from HBM; cast to the weight
    # dtype (bf16) on the VPU so the MXU runs bf16 with f32 accumulation.
    x = x_ref[...].astype(w1_ref.dtype)
    h = jnp.dot(x, w1_ref[...], preferred_element_type=jnp.float32)
    h = jnp.maximum(h + b1, 0.0)

    # FC2: cast activations back to the weight dtype for the second bf16 matmul.
    y = jnp.dot(h.astype(w2_ref.dtype), w2_ref[...],
                preferred_element_type=jnp.float32)
    y = y + b2

    # LayerNorm over the hidden dim (biased variance, matches torch.nn.LayerNorm).
    # Two-pass (centered) variance kept for numerical safety; XLU reductions are
    # not the binding resource here.
    mean = jnp.mean(y, axis=-1, keepdims=True)
    cent = y - mean
    var = jnp.mean(cent * cent, axis=-1, keepdims=True)
    out = cent * jax.lax.rsqrt(var + LN_EPS) * gamma + beta

    # Dropout(p=0.0) == identity.
    o_ref[...] = out.astype(o_ref.dtype)


def _round_up(n, m):
    return ((n + m - 1) // m) * m


def _pick_row_tile(n_rows, requested):
    """Pick the per-step row-block size.

    * Shrink to cover tiny N in one block (no wasted pipeline steps).
    * When there is enough work, ensure >= 2 grid steps so the two v7x
      TensorCores both get a share of the "parallel" row axis (no effect on
      v5e/v6e, which have a single TensorCore).
    * f32 x blocks only need a multiple of 8 in the sublane dim.
    """
    t = min(requested, _round_up(n_rows, 8))
    if n_rows >= 512 and pl.cdiv(n_rows, t) < 2:
        t = _round_up(pl.cdiv(n_rows, 2), 8)
    return t


def _vmem_budget_bytes(tm, F, D, w_itemsize):
    """Explicit scoped-VMEM budget for the chosen tile size.

    2x double-buffered f32 x blocks + 2x f32 out blocks + 2x resident bf16
    weights + params, plus headroom for the f32 h/y temporaries and spills.
    tm=1024 -> ~26 MiB: above v5e's 16 MiB default scoped limit (must be
    raised explicitly), comfortably inside v6e/v7x budgets.
    """
    x_blk = tm * F * 4
    o_blk = tm * D * 4
    w1b = F * D * w_itemsize
    w2b = D * D * w_itemsize
    par = 4 * D * 4
    return 2 * (x_blk + o_blk + w1b + w2b + par) + (8 << 20)


def pack_params(w1, b1, w2, b2, gamma, beta, compute_dtype=jnp.bfloat16):
    """One-time weight preparation (keep this OUT of the per-call hot path)."""
    w1c = jnp.asarray(w1, dtype=compute_dtype)
    w2c = jnp.asarray(w2, dtype=compute_dtype)
    params = jnp.stack(
        [jnp.asarray(b1, jnp.float32), jnp.asarray(b2, jnp.float32),
         jnp.asarray(gamma, jnp.float32), jnp.asarray(beta, jnp.float32)],
        axis=0)                                           # (4, D)
    return w1c, w2c, params


@functools.partial(jax.jit, static_argnames=("row_tile",))
def visual_feat_encoder(x, w1c, w2c, params, *, row_tile=1024):
    """x: (B, S, F) f32 -> (B, S, D) f32, fused Linear->ReLU->Linear->LayerNorm.

    w1c/w2c/params come from pack_params (bf16 weights, stacked f32 vectors).
    """
    B, S, F = x.shape
    D = w1c.shape[1]
    N = B * S

    tm = _pick_row_tile(N, row_tile)
    grid = (pl.cdiv(N, tm),)

    x2 = x.reshape(N, F)                                  # no dtype cast here
    w_itemsize = jnp.dtype(w1c.dtype).itemsize

    cost = pl.CostEstimate(
        flops=2 * N * F * D + 2 * N * D * D + 10 * N * D,
        transcendentals=N,  # one rsqrt per row
        bytes_accessed=(N * F * 4                         # f32 x read
                        + (F * D + D * D) * w_itemsize    # bf16 weights
                        + 4 * D * 4                       # params
                        + N * D * 4),                     # f32 out
    )

    out2 = pl.pallas_call(
        _encoder_kernel,
        out_shape=jax.ShapeDtypeStruct((N, D), jnp.float32),
        grid_spec=pltpu.PrefetchScalarGridSpec(
            num_scalar_prefetch=0,
            grid=grid,
            in_specs=[
                pl.BlockSpec((tm, F), lambda i: (i, 0)),   # x rows (pipelined, f32)
                pl.BlockSpec((F, D), lambda i: (0, 0)),    # w1 resident (constant index)
                pl.BlockSpec((D, D), lambda i: (0, 0)),    # w2 resident
                pl.BlockSpec((4, D), lambda i: (0, 0)),    # [b1; b2; gamma; beta]
            ],
            out_specs=pl.BlockSpec((tm, D), lambda i: (i, 0)),
        ),
        compiler_params=pltpu.CompilerParams(
            dimension_semantics=("parallel",),
            vmem_limit_bytes=_vmem_budget_bytes(tm, F, D, w_itemsize),
        ),
        cost_estimate=cost,
    )(x2, w1c, w2c, params)

    return out2.reshape(B, S, D)


def _reference(x, w1, b1, w2, b2, gamma, beta, compute_dtype=jnp.float32):
    """Pure-JAX reference; compute_dtype mirrors the kernel's matmul precision."""
    cd = compute_dtype
    h = jnp.dot(x.astype(cd), w1.astype(cd), preferred_element_type=jnp.float32)
    h = jnp.maximum(h + b1, 0.0)
    y = jnp.dot(h.astype(cd), w2.astype(cd), preferred_element_type=jnp.float32) + b2
    mean = jnp.mean(y, axis=-1, keepdims=True)
    var = jnp.mean((y - mean) ** 2, axis=-1, keepdims=True)
    return (y - mean) / jnp.sqrt(var + LN_EPS) * gamma + beta


if __name__ == "__main__":
    # Small shapes consistent with the module's forward:
    #   visn_input: (batch, num_boxes, feat_dim) = (2, 8, 2048), hidden dim = 128.
    B, S, FEAT_DIM, DIM = 2, 8, 2048, 128

    key = jax.random.PRNGKey(0)
    k_x, k_w1, k_b1, k_w2, k_b2 = jax.random.split(key, 5)

    x = jax.random.normal(k_x, (B, S, FEAT_DIM), dtype=jnp.float32)
    w1 = jax.random.normal(k_w1, (FEAT_DIM, DIM), dtype=jnp.float32) * 0.02
    b1 = jax.random.normal(k_b1, (DIM,), dtype=jnp.float32) * 0.02
    w2 = jax.random.normal(k_w2, (DIM, DIM), dtype=jnp.float32) * 0.02
    b2 = jax.random.normal(k_b2, (DIM,), dtype=jnp.float32) * 0.02
    gamma = jnp.ones((DIM,), dtype=jnp.float32)       # nn.LayerNorm default weight
    beta = jnp.zeros((DIM,), dtype=jnp.float32)       # nn.LayerNorm default bias

    # One-time weight packing (outside the per-call hot path).
    w1c, w2c, params = pack_params(w1, b1, w2, b2, gamma, beta)

    out = visual_feat_encoder(x, w1c, w2c, params)
    out = jax.block_until_ready(out)
    assert out.shape == (B, S, DIM), out.shape

    # Tight check against a reference that uses the same bf16-matmul / f32-accumulate
    # recipe as the kernel (validates the kernel itself).
    ref_bf16 = _reference(x, w1, b1, w2, b2, gamma, beta, compute_dtype=jnp.bfloat16)
    err = float(jnp.max(jnp.abs(out - ref_bf16)))
    assert jnp.allclose(out, ref_bf16, atol=1e-4, rtol=1e-4), err

    # Loose sanity check against the pure-f32 module semantics (bounds bf16 drift).
    ref_f32 = _reference(x, w1, b1, w2, b2, gamma, beta, compute_dtype=jnp.float32)
    err32 = float(jnp.max(jnp.abs(out - ref_f32)))
    assert jnp.allclose(out, ref_f32, atol=1.5e-1, rtol=0.0), err32

    print("KERNEL_OK")
</pallas_src>

<mosaic_0001>
module attributes {stable_mosaic.version = 11 : i64} {
  func.func @_encoder_kernel(%arg0: i32, %arg1: memref<16x2048xf32, #tpu.memory_space<vmem>>, %arg2: memref<2048x128xbf16, #tpu.memory_space<vmem>>, %arg3: memref<128x128xbf16, #tpu.memory_space<vmem>>, %arg4: memref<4x128xf32, #tpu.memory_space<vmem>>, %arg5: memref<16x128xf32, #tpu.memory_space<vmem>>) attributes {dimension_semantics = [#tpu.dimension_semantics<parallel>], iteration_bounds = array<i64: 1>, scalar_prefetch = 0 : i64, scratch_operands = 0 : i64, tpu.core_type = #tpu.core_type<tc>, window_params = [{transform_indices = @transform_0, window_bounds = array<i64: 16, 2048>}, {pipeline_mode = #tpu.pipeline_mode<synchronous>, transform_indices = @transform_1, window_bounds = array<i64: 2048, 128>}, {pipeline_mode = #tpu.pipeline_mode<synchronous>, transform_indices = @transform_2, window_bounds = array<i64: 128, 128>}, {pipeline_mode = #tpu.pipeline_mode<synchronous>, transform_indices = @transform_3, window_bounds = array<i64: 4, 128>}, {transform_indices = @transform_4, window_bounds = array<i64: 16, 128>}]} {
    %c0 = arith.constant 0 : index
    %c0_0 = arith.constant 0 : index
    %0 = vector.load %arg4[%c0, %c0_0] : memref<4x128xf32, #tpu.memory_space<vmem>>, vector<4x128xf32>
    %1 = vector.extract_strided_slice %0 {offsets = [0, 0], sizes = [1, 128], strides = [1, 1]} : vector<4x128xf32> to vector<1x128xf32>
    %2 = vector.extract_strided_slice %0 {offsets = [1, 0], sizes = [1, 128], strides = [1, 1]} : vector<4x128xf32> to vector<1x128xf32>
    %3 = vector.extract_strided_slice %0 {offsets = [2, 0], sizes = [1, 128], strides = [1, 1]} : vector<4x128xf32> to vector<1x128xf32>
    %4 = vector.extract_strided_slice %0 {offsets = [3, 0], sizes = [1, 128], strides = [1, 1]} : vector<4x128xf32> to vector<1x128xf32>
    %c0_1 = arith.constant 0 : index
    %c0_2 = arith.constant 0 : index
    %5 = vector.load %arg1[%c0_1, %c0_2] : memref<16x2048xf32, #tpu.memory_space<vmem>>, vector<16x2048xf32>
    %6 = arith.truncf %5 : vector<16x2048xf32> to vector<16x2048xbf16>
    %c0_3 = arith.constant 0 : index
    %c0_4 = arith.constant 0 : index
    %7 = vector.load %arg2[%c0_3, %c0_4] : memref<2048x128xbf16, #tpu.memory_space<vmem>>, vector<2048x128xbf16>
    %cst = arith.constant dense<0.000000e+00> : vector<16x128xf32>
    %8 = tpu.matmul %6, %7, %cst {dimension_numbers = #tpu.dot_dimension_numbers<[1], [0], [0], [1], [0, 0, 1, 1], [], []>} : vector<16x2048xbf16>, vector<2048x128xbf16>, vector<16x128xf32> -> vector<16x128xf32>
    %9 = vector.broadcast %1 : vector<1x128xf32> to vector<16x128xf32>
    %10 = arith.addf %8, %9 : vector<16x128xf32>
    %cst_5 = arith.constant 0.000000e+00 : f32
    %11 = vector.broadcast %cst_5 : f32 to vector<16x128xf32>
    %12 = arith.maximumf %10, %11 : vector<16x128xf32>
    %13 = arith.truncf %12 : vector<16x128xf32> to vector<16x128xbf16>
    %c0_6 = arith.constant 0 : index
    %c0_7 = arith.constant 0 : index
    %14 = vector.load %arg3[%c0_6, %c0_7] : memref<128x128xbf16, #tpu.memory_space<vmem>>, vector<128x128xbf16>
    %cst_8 = arith.constant dense<0.000000e+00> : vector<16x128xf32>
    %15 = tpu.matmul %13, %14, %cst_8 {dimension_numbers = #tpu.dot_dimension_numbers<[1], [0], [0], [1], [0, 0, 1, 1], [], []>} : vector<16x128xbf16>, vector<128x128xbf16>, vector<16x128xf32> -> vector<16x128xf32>
    %16 = vector.broadcast %2 : vector<1x128xf32> to vector<16x128xf32>
    %17 = arith.addf %15, %16 : vector<16x128xf32>
    %cst_9 = arith.constant dense<0.000000e+00> : vector<16xf32>
    %18 = vector.multi_reduction <add>, %17, %cst_9 [1] : vector<16x128xf32> to vector<16xf32>
    %19 = vector.shape_cast %18 : vector<16xf32> to vector<16x1xf32>
    %cst_10 = arith.constant 1.280000e+02 : f32
    %20 = vector.broadcast %cst_10 : f32 to vector<16x1xf32>
    %21 = arith.divf %19, %20 : vector<16x1xf32>
    %22 = vector.broadcast %21 : vector<16x1xf32> to vector<16x128xf32>
    %23 = arith.subf %17, %22 : vector<16x128xf32>
    %24 = arith.mulf %23, %23 : vector<16x128xf32>
    %cst_11 = arith.constant dense<0.000000e+00> : vector<16xf32>
    %25 = vector.multi_reduction <add>, %24, %cst_11 [1] : vector<16x128xf32> to vector<16xf32>
    %26 = vector.shape_cast %25 : vector<16xf32> to vector<16x1xf32>
    %cst_12 = arith.constant 1.280000e+02 : f32
    %27 = vector.broadcast %cst_12 : f32 to vector<16x1xf32>
    %28 = arith.divf %26, %27 : vector<16x1xf32>
    %cst_13 = arith.constant 9.99999996E-13 : f32
    %29 = vector.broadcast %cst_13 : f32 to vector<16x1xf32>
    %30 = arith.addf %28, %29 : vector<16x1xf32>
    %31 = math.rsqrt %30 : vector<16x1xf32>
    %32 = vector.broadcast %31 : vector<16x1xf32> to vector<16x128xf32>
    %33 = arith.mulf %23, %32 : vector<16x128xf32>
    %34 = vector.broadcast %3 : vector<1x128xf32> to vector<16x128xf32>
    %35 = arith.mulf %33, %34 : vector<16x128xf32>
    %36 = vector.broadcast %4 : vector<1x128xf32> to vector<16x128xf32>
    %37 = arith.addf %35, %36 : vector<16x128xf32>
    %c0_14 = arith.constant 0 : index
    %c0_15 = arith.constant 0 : index
    %38 = vector.load %arg5[%c0_14, %c0_15] : memref<16x128xf32, #tpu.memory_space<vmem>>, vector<16x128xf32>
    tpu.vector_store %arg5[%c0_14, %c0_15], %37 {strides = array<i32>} : memref<16x128xf32, #tpu.memory_space<vmem>>, vector<16x128xf32>,
    return
  }
  func.func @transform_0(%arg0: i32) -> (i32, i32) {
    %c0_i32 = arith.constant 0 : i32
    %c0_i32_0 = arith.constant 0 : i32
    return %arg0, %c0_i32 : i32, i32
  }
  func.func @transform_1(%arg0: i32) -> (i32, i32) {
    %c0_i32 = arith.constant 0 : i32
    %c0_i32_0 = arith.constant 0 : i32
    %c0_i32_1 = arith.constant 0 : i32
    return %c0_i32, %c0_i32_0 : i32, i32
  }
  func.func @transform_2(%arg0: i32) -> (i32, i32) {
    %c0_i32 = arith.constant 0 : i32
    %c0_i32_0 = arith.constant 0 : i32
    %c0_i32_1 = arith.constant 0 : i32
    return %c0_i32, %c0_i32_0 : i32, i32
  }
  func.func @transform_3(%arg0: i32) -> (i32, i32) {
    %c0_i32 = arith.constant 0 : i32
    %c0_i32_0 = arith.constant 0 : i32
    %c0_i32_1 = arith.constant 0 : i32
    return %c0_i32, %c0_i32_0 : i32, i32
  }
  func.func @transform_4(%arg0: i32) -> (i32, i32) {
    %c0_i32 = arith.constant 0 : i32
    %c0_i32_0 = arith.constant 0 : i32
    return %arg0, %c0_i32 : i32, i32
  }
}

</mosaic_0001>

<bundles_post_ra>
// kernel: visual_feat_encoder.1
= control target key start
LH: loop header
LB: loop body
LE: loop exit
PB: predicated region body
PF: predicated region fallthrough
CT: control target
= control target key end

     0   :  { %9 = vsyncpa [#allocation3], 0  ;;  %s2326_s0 = inlined_call_operand.hbm [shape: f32[16,2048], index: 0, kind: input, shape index: {}]   ;;  %s2327_s1 = inlined_call_operand.hbm [shape: bf16[2048,128], index: 1, kind: input, shape index: {}]   ;;  %s2328_s2 = inlined_call_operand.hbm [shape: bf16[128,128], index: 2, kind: input, shape index: {}]   ;;  %s2329_s3 = inlined_call_operand.vmem [shape: f32[4,128], index: 3, kind: input, shape index: {}]   ;;  %s2330_s4 = inlined_call_operand.hbm [shape: f32[16,128], index: 4, kind: output, shape index: {}]  }
   0x1   :  { %10 = vsyncpa [#allocation6], 0 }
   0x2   :  { %11 = vsyncpa [#allocation4], 0  ;;  %s2218_s15 = smov [#allocation5]   ;;  %s2124_s19 = scalar_lea.hbm %s2327_s1, 16384 }
   0x3   :  { %s29_s16 = sshll.u32 %s2218_s15, 4  ;;  %p2125_p0 = scmp.ne.s32.totalorder %s2327_s1, %s2124_s19  ;;  %s30_s16 = int_to_ptr.vmem [resolvable:$true] %s29_s16 }
   0x4   :  { %p2128_p1 = scmp.lt.u32.totalorder %s2124_s19, %s2327_s1 }
   0x6   :  { %p2130_p2 = pnand %p2128_p1, %p2125_p0 }
   0x8   :  { %2133 = shalt.err (!%p2130_p2)
}
   0x9   :  { %s2134_s24 = scalar_lea.vmem %s30_s16, 16384  ;;  %p2139_p4 = scmp.lt.s32.totalorder %s30_s16, %s30_s16 }
   0xa   :  { %p2135_p3 = scmp.ne.s32.totalorder %s30_s16, %s2134_s24  ;;  %p2140_p5 = scmp.lt.s32.totalorder %s2134_s24, %s2134_s24 }
   0xc   :  { %p2141_p6 = por %p2140_p5, %p2139_p4 }
   0xe   :  { %p2142_p7 = pnand %p2141_p6, %p2135_p3 }
  0x10   :  { %2145 = shalt.err (!%p2142_p7)
}
  0x11   :  { %s2219_s25 = smov 64   ;;  %s2220_s26 = smov 4  }
  0x12   :  { %35 = dma.hbm_to_vmem [thread:$0]  %s2327_s1, 16384, %s30_s16, [#allocation6], %s2219_s25, %s2219_s25, %s2220_s26  }
  0x13   :  { %s2221_s29 = smov [#allocation2]   ;;  %s2146_s7 = scalar_lea.hbm %s2326_s0, 4096 }
  0x14   :  { %s17_s30 = sshll.u32 %s2221_s29, 4  ;;  %p2147_p8 = scmp.ne.s32.totalorder %s2326_s0, %s2146_s7  ;;  %s18_s30 = int_to_ptr.vmem [resolvable:$true] %s17_s30 }
  0x15   :  { %p2150_p9 = scmp.lt.u32.totalorder %s2146_s7, %s2326_s0 }
  0x17   :  { %p2152_p10 = pnand %p2150_p9, %p2147_p8 }
  0x19   :  { %2155 = shalt.err (!%p2152_p10)
}
  0x1a   :  { %s2156_s12 = scalar_lea.vmem %s18_s30, 4096  ;;  %p2161_p12 = scmp.lt.s32.totalorder %s18_s30, %s18_s30 }
  0x1b   :  { %p2157_p11 = scmp.ne.s32.totalorder %s18_s30, %s2156_s12  ;;  %p2162_p13 = scmp.lt.s32.totalorder %s2156_s12, %s2156_s12 }
  0x1d   :  { %p2163_p0 = por %p2162_p13, %p2161_p12 }
  0x1f   :  { %p2164_p1 = pnand %p2163_p0, %p2157_p11 }
  0x21   :  { %2167 = shalt.err (!%p2164_p1)
}
  0x22   :  { %s2222_s1 = smov 2048   ;;  %s2223_s13 = smov 128  }
  0x23   :  { %23 = dma.hbm_to_vmem [thread:$0]  %s2326_s0, 4096, %s18_s30, [#allocation3], %s2222_s1, %s2222_s1, %s2223_s13  }
  0x24   :  { %s2224_s16 = smov [#allocation7]   ;;  %s2168_s20 = scalar_lea.hbm %s2328_s2, 1024 }
  0x25   :  { %s41_s17 = sshll.u32 %s2224_s16, 4  ;;  %p2169_p2 = scmp.ne.s32.totalorder %s2328_s2, %s2168_s20  ;;  %s42_s17 = int_to_ptr.vmem [resolvable:$true] %s41_s17 }
  0x26   :  { %p2172_p3 = scmp.lt.u32.totalorder %s2168_s20, %s2328_s2 }
  0x28   :  { %p2174_p4 = pnand %p2172_p3, %p2169_p2 }
  0x2a   :  { %2177 = shalt.err (!%p2174_p4)
}
  0x2b   :  { %s2178_s27 = scalar_lea.vmem %s42_s17, 1024  ;;  %p2183_p6 = scmp.lt.s32.totalorder %s42_s17, %s42_s17 }
  0x2c   :  { %p2179_p5 = scmp.ne.s32.totalorder %s42_s17, %s2178_s27  ;;  %p2184_p7 = scmp.lt.s32.totalorder %s2178_s27, %s2178_s27 }
  0x2e   :  { %p2185_p8 = por %p2184_p7, %p2183_p6 }
  0x30   :  { %p2186_p9 = pnand %p2185_p8, %p2179_p5 }
  0x32   :  { %2189 = shalt.err (!%p2186_p9)
}
  0x33   :  { %47 = dma.hbm_to_vmem [thread:$0]  %s2328_s2, 1024, %s42_s17, [#allocation6], %s2219_s25, %s2219_s25, %s2220_s26  }
  0x34   :  { %2212 = dma.done.wait [#allocation3], 4096  }
  0x35   :  { %2213 = vsyncadd [#allocation3], 4294963200 }
  0x36   :  { %2214 = dma.done.wait [#allocation6], 17408  }
  0x37   :  { %2215 = vsyncadd [#allocation6], 4294949888  ;;  %v1984_v0 = vld [vmem:[#allocation5 + $0x40] sm:$0xff]   ;;  %v1988_v4 = vld [vmem:[#allocation5 + $0x48] sm:$0xff]   ;;  %vm2226_vm0 = vmmov 0  }
  0x38   :  { %v1985_v1 = vld [vmem:[#allocation5 + $0xc0] sm:$0xff]   ;;  %1768 = vmatprep.subr.bf16.mxu0 %v1984_v0  ;;  %v1989_v5 = vld [vmem:[#allocation5 + $0xc8] sm:$0xff]   ;;  %v1992_v8 = vld [vmem:[#allocation5 + $0x50] sm:$0xff]  }
  0x39   :  { %v1986_v2 = vld [vmem:[#allocation5] sm:$0xff]   ;;  %1790 = vmatprep.subr.bf16.mxu1 %v1985_v1  ;;  %v1990_v6 = vld [vmem:[#allocation5 + $0x8] sm:$0xff]   ;;  %v1993_v9 = vld [vmem:[#allocation5 + $0xd0] sm:$0xff]  }
  0x3a   :  { %v1987_v3 = vld [vmem:[#allocation5 + $0x80] sm:$0xff]   ;;  %1769 = vmatpush3.bf16.msra.mxu0 %v1986_v2  ;;  %v1991_v7 = vld [vmem:[#allocation5 + $0x88] sm:$0xff]   ;;  %v1994_v10 = vld [vmem:[#allocation5 + $0x10] sm:$0xff]  }
  0x3b   :  { %1791 = vmatpush3.bf16.msra.mxu1 %v1987_v3  ;;  %1770 = vmatprep.subr.bf16.mxu0 %v1988_v4  ;;  %v1995_v11 = vld [vmem:[#allocation5 + $0x90] sm:$0xff]   ;;  %v1996_v12 = vld [vmem:[#allocation5 + $0x58] sm:$0xff]   ;;  %v2000_v16 = vld [vmem:[#allocation5 + $0x60] sm:$0xff]  }
  0x3c   :  { %1792 = vmatprep.subr.bf16.mxu1 %v1989_v5  ;;  %v1997_v13 = vld [vmem:[#allocation5 + $0xd8] sm:$0xff]   ;;  %v2001_v17 = vld [vmem:[#allocation5 + $0xe0] sm:$0xff]   ;;  %v2004_v20 = vld [vmem:[#allocation5 + $0x68] sm:$0xff]  }
  0x3d   :  { %v1998_v14 = vld [vmem:[#allocation5 + $0x18] sm:$0xff]   ;;  %v2002_v18 = vld [vmem:[#allocation5 + $0x20] sm:$0xff]   ;;  %v2005_v21 = vld [vmem:[#allocation5 + $0xe8] sm:$0xff]  }
  0x3e   :  { %1771 = vmatpush3.bf16.msra.mxu0 %v1990_v6  ;;  %v1999_v15 = vld [vmem:[#allocation5 + $0x98] sm:$0xff]   ;;  %v2003_v19 = vld [vmem:[#allocation5 + $0xa0] sm:$0xff]   ;;  %v2006_v22 = vld [vmem:[#allocation5 + $0x28] sm:$0xff]  }
  0x3f   :  { %1793 = vmatpush3.bf16.msra.mxu1 %v1991_v7  ;;  %1772 = vmatprep.subr.bf16.mxu0 %v1992_v8  ;;  %v2007_v23 = vld [vmem:[#allocation5 + $0xa8] sm:$0xff]   ;;  %v2008_v24 = vld [vmem:[#allocation5 + $0x70] sm:$0xff]   ;;  %v2012_v28 = vld [vmem:[#allocation5 + $0x78] sm:$0xff]  }
  0x40   :  { %1794 = vmatprep.subr.bf16.mxu1 %v1993_v9  ;;  %v2009_v25 = vld [vmem:[#allocation5 + $0xf0] sm:$0xff]   ;;  %v2013_v29 = vld [vmem:[#allocation5 + $0xf8] sm:$0xff]   ;;  %v62_v32 = vld [vmem:[#allocation2 + $0x8] sm:$0xff] }
  0x41   :  { %v2010_v26 = vld [vmem:[#allocation5 + $0x30] sm:$0xff]   ;;  %v2014_v30 = vld [vmem:[#allocation5 + $0x38] sm:$0xff]   ;;  %v78_v33 = vld [vmem:[#allocation2 + $0x88] sm:$0xff] }
  0x42   :  { %1773 = vmatpush3.bf16.msra.mxu0 %v1994_v10  ;;  %v2011_v27 = vld [vmem:[#allocation5 + $0xb0] sm:$0xff]   ;;  %v2015_v31 = vld [vmem:[#allocation5 + $0xb8] sm:$0xff]   ;;  %v94_v35 = vpack.c.bf16 %v78_v33, %v62_v32  ;;  %v61_v37 = vld [vmem:[#allocation2] sm:$0xff] }
  0x43   :  { %1795 = vmatpush3.bf16.msra.mxu1 %v1995_v11  ;;  %1774 = vmatprep.subr.bf16.mxu0 %v1996_v12  ;;  %v64_v34 = vld [vmem:[#allocation2 + $0x18] sm:$0xff]  ;;  %v77_v38 = vld [vmem:[#allocation2 + $0x80] sm:$0xff]  ;;  %v63_v41 = vld [vmem:[#allocation2 + $0x10] sm:$0xff] }
  0x44   :  { %1796 = vmatprep.subr.bf16.mxu1 %v1997_v13  ;;  %v80_v36 = vld [vmem:[#allocation2 + $0x98] sm:$0xff]  ;;  %v93_v40 = vpack.c.bf16 %v77_v38, %v61_v37  ;;  %v79_v42 = vld [vmem:[#allocation2 + $0x90] sm:$0xff]  ;;  %1169 = vmatprep.mubr.bf16.mxu0 %v94_v35  ;;  %v2016_v44 = vld [vmem:[#allocation5 + $0x140] sm:$0xff]  }
  0x45   :  { %v96_v39 = vpack.c.bf16 %v80_v36, %v64_v34  ;;  %v95_v43 = vpack.c.bf16 %v79_v42, %v63_v41  ;;  %v2017_v45 = vld [vmem:[#allocation5 + $0x1c0] sm:$0xff]   ;;  %v2020_v48 = vld [vmem:[#allocation5 + $0x148] sm:$0xff]   ;;  %v2024_v52 = vld [vmem:[#allocation5 + $0x150] sm:$0xff]  }
  0x46   :  { %1775 = vmatpush3.bf16.msra.mxu0 %v1998_v14  ;;  %v2018_v46 = vld [vmem:[#allocation5 + $0x100] sm:$0xff]   ;;  %v2021_v49 = vld [vmem:[#allocation5 + $0x1c8] sm:$0xff]   ;;  %v2025_v53 = vld [vmem:[#allocation5 + $0x1d0] sm:$0xff]  }
  0x47   :  { %1797 = vmatpush3.bf16.msra.mxu1 %v1999_v15  ;;  %1776 = vmatprep.subr.bf16.mxu0 %v2000_v16  ;;  %v2019_v47 = vld [vmem:[#allocation5 + $0x180] sm:$0xff]   ;;  %v2022_v50 = vld [vmem:[#allocation5 + $0x108] sm:$0xff]   ;;  %v2026_v54 = vld [vmem:[#allocation5 + $0x110] sm:$0xff]  }
  0x48   :  { %1798 = vmatprep.subr.bf16.mxu1 %v2001_v17  ;;  %1210 = vmatprep.mubr.bf16.mxu1 %v96_v39  ;;  %v2023_v51 = vld [vmem:[#allocation5 + $0x188] sm:$0xff]   ;;  %v2027_v55 = vld [vmem:[#allocation5 + $0x190] sm:$0xff]   ;;  %v2028_v56 = vld [vmem:[#allocation5 + $0x158] sm:$0xff]  }
  0x49   :  { %v2029_v57 = vld [vmem:[#allocation5 + $0x1d8] sm:$0xff]   ;;  %v2032_v60 = vld [vmem:[#allocation5 + $0x160] sm:$0xff]   ;;  %v2036_v0 = vld [vmem:[#allocation5 + $0x168] sm:$0xff]  }
  0x4a   :  { %1777 = vmatpush3.bf16.msra.mxu0 %v2002_v18  ;;  %v2030_v58 = vld [vmem:[#allocation5 + $0x118] sm:$0xff]   ;;  %v2033_v61 = vld [vmem:[#allocation5 + $0x1e0] sm:$0xff]   ;;  %v2037_v1 = vld [vmem:[#allocation5 + $0x1e8] sm:$0xff]  }
  0x4b   :  { %1799 = vmatpush3.bf16.msra.mxu1 %v2003_v19  ;;  %1778 = vmatprep.subr.bf16.mxu0 %v2004_v20  ;;  %v2031_v59 = vld [vmem:[#allocation5 + $0x198] sm:$0xff]   ;;  %v2034_v62 = vld [vmem:[#allocation5 + $0x120] sm:$0xff]   ;;  %v2038_v2 = vld [vmem:[#allocation5 + $0x128] sm:$0xff]  }
  0x4c   :  { %1800 = vmatprep.subr.bf16.mxu1 %v2005_v21  ;;  %v2035_v63 = vld [vmem:[#allocation5 + $0x1a0] sm:$0xff]   ;;  %v2039_v3 = vld [vmem:[#allocation5 + $0x1a8] sm:$0xff]   ;;  %v2040_v4 = vld [vmem:[#allocation5 + $0x170] sm:$0xff]  }
  0x4d   :  { %v2041_v5 = vld [vmem:[#allocation5 + $0x1f0] sm:$0xff]   ;;  %v2044_v8 = vld [vmem:[#allocation5 + $0x178] sm:$0xff]   ;;  %v66_v12 = vld [vmem:[#allocation2 + $0x28] sm:$0xff] }
  0x4e   :  { %1779 = vmatpush3.bf16.msra.mxu0 %v2006_v22  ;;  %v2042_v6 = vld [vmem:[#allocation5 + $0x130] sm:$0xff]   ;;  %v2045_v9 = vld [vmem:[#allocation5 + $0x1f8] sm:$0xff]   ;;  %v82_v13 = vld [vmem:[#allocation2 + $0xa8] sm:$0xff] }
  0x4f   :  { %1801 = vmatpush3.bf16.msra.mxu1 %v2007_v23  ;;  %1780 = vmatprep.subr.bf16.mxu0 %v2008_v24  ;;  %v2043_v7 = vld [vmem:[#allocation5 + $0x1b0] sm:$0xff]   ;;  %v2046_v10 = vld [vmem:[#allocation5 + $0x138] sm:$0xff]   ;;  %v98_v16 = vpack.c.bf16 %v82_v13, %v66_v12  ;;  %v65_v18 = vld [vmem:[#allocation2 + $0x20] sm:$0xff] }
  0x50   :  { %1802 = vmatprep.subr.bf16.mxu1 %v2009_v25  ;;  %v2047_v11 = vld [vmem:[#allocation5 + $0x1b8] sm:$0xff]   ;;  %v81_v19 = vld [vmem:[#allocation2 + $0xa0] sm:$0xff]  ;;  %v67_v20 = vld [vmem:[#allocation2 + $0x30] sm:$0xff] }
  0x51   :  { %v68_v14 = vld [vmem:[#allocation2 + $0x38] sm:$0xff]  ;;  %v97_v21 = vpack.c.bf16 %v81_v19, %v65_v18  ;;  %v83_v22 = vld [vmem:[#allocation2 + $0xb0] sm:$0xff]  ;;  %v2048_v24 = vld [vmem:[#allocation5 + $0x240] sm:$0xff]  }
  0x52   :  { %1781 = vmatpush3.bf16.msra.mxu0 %v2010_v26  ;;  %v84_v15 = vld [vmem:[#allocation2 + $0xb8] sm:$0xff]  ;;  %v99_v23 = vpack.c.bf16 %v83_v22, %v67_v20  ;;  %v2049_v25 = vld [vmem:[#allocation5 + $0x2c0] sm:$0xff]   ;;  %v2056_v32 = vld [vmem:[#allocation5 + $0x250] sm:$0xff]  }
  0x53   :  { %1803 = vmatpush3.bf16.msra.mxu1 %v2011_v27  ;;  %1782 = vmatprep.subr.bf16.mxu0 %v2012_v28  ;;  %v100_v17 = vpack.c.bf16 %v84_v15, %v68_v14  ;;  %v2050_v26 = vld [vmem:[#allocation5 + $0x200] sm:$0xff]   ;;  %v2052_v28 = vld [vmem:[#allocation5 + $0x248] sm:$0xff]   ;;  %v2057_v33 = vld [vmem:[#allocation5 + $0x2d0] sm:$0xff]  }
  0x54   :  { %1804 = vmatprep.subr.bf16.mxu1 %v2013_v29  ;;  %v2051_v27 = vld [vmem:[#allocation5 + $0x280] sm:$0xff]   ;;  %v2053_v29 = vld [vmem:[#allocation5 + $0x2c8] sm:$0xff]   ;;  %v2058_v34 = vld [vmem:[#allocation5 + $0x210] sm:$0xff]  }
  0x55   :  { %v2059_v35 = vld [vmem:[#allocation5 + $0x290] sm:$0xff]   ;;  %v2060_v36 = vld [vmem:[#allocation5 + $0x258] sm:$0xff]   ;;  %v2065_v41 = vld [vmem:[#allocation5 + $0x2e0] sm:$0xff]  }
  0x56   :  { %1783 = vmatpush3.bf16.msra.mxu0 %v2014_v30  ;;  %v2054_v30 = vld [vmem:[#allocation5 + $0x208] sm:$0xff]   ;;  %v2061_v37 = vld [vmem:[#allocation5 + $0x2d8] sm:$0xff]   ;;  %v2066_v42 = vld [vmem:[#allocation5 + $0x220] sm:$0xff]  }
  0x57   :  { %1805 = vmatpush3.bf16.msra.mxu1 %v2015_v31  ;;  %1812 = vmatprep.subr.bf16.mxu0 %v2016_v44  ;;  %v2055_v31 = vld [vmem:[#allocation5 + $0x288] sm:$0xff]   ;;  %v2062_v38 = vld [vmem:[#allocation5 + $0x218] sm:$0xff]   ;;  %v2088_v12 = vld [vmem:[#allocation5 + $0x350] sm:$0xff]  }
  0x58   :  { %1834 = vmatprep.subr.bf16.mxu1 %v2017_v45  ;;  %v2063_v39 = vld [vmem:[#allocation5 + $0x298] sm:$0xff]   ;;  %v2068_v44 = vld [vmem:[#allocation5 + $0x268] sm:$0xff]   ;;  %v2089_v13 = vld [vmem:[#allocation5 + $0x3d0] sm:$0xff]  }
  0x59   :  { %1170 = vmatmul.mubr.bf16.vlgmr.msra.gmra.mrb[0].mxu0 %v93_v40  ;;  %v2064_v40 = vld [vmem:[#allocation5 + $0x260] sm:$0xff]   ;;  %v2069_v45 = vld [vmem:[#allocation5 + $0x2e8] sm:$0xff]   ;;  %v2090_v14 = vld [vmem:[#allocation5 + $0x310] sm:$0xff]  }
  0x5a   :  { %1211 = vmatmul.mubr.bf16.vlgmr.msra.gmra.mrb[0].mxu1 %v95_v43  ;;  %1813 = vmatpush3.bf16.msra.mxu0 %v2018_v46  ;;  %v2067_v43 = vld [vmem:[#allocation5 + $0x2a0] sm:$0xff]   ;;  %v2070_v46 = vld [vmem:[#allocation5 + $0x228] sm:$0xff]   ;;  %v2091_v15 = vld [vmem:[#allocation5 + $0x390] sm:$0xff]  }
  0x5b   :  { %1835 = vmatpush3.bf16.msra.mxu1 %v2019_v47  ;;  %1814 = vmatprep.subr.bf16.mxu0 %v2020_v48  ;;  %v2071_v47 = vld [vmem:[#allocation5 + $0x2a8] sm:$0xff]   ;;  %v2072_v48 = vld [vmem:[#allocation5 + $0x270] sm:$0xff]   ;;  %v2094_v18 = vld [vmem:[#allocation5 + $0x318] sm:$0xff]  }
  0x5c   :  { %1836 = vmatprep.subr.bf16.mxu1 %v2021_v49  ;;  %1251 = vmatprep.mubr.bf16.mxu0 %v98_v16  ;;  %v2073_v49 = vld [vmem:[#allocation5 + $0x2f0] sm:$0xff]   ;;  %v2092_v16 = vld [vmem:[#allocation5 + $0x358] sm:$0xff]   ;;  %v2096_v20 = vld [vmem:[#allocation5 + $0x360] sm:$0xff]  }
  0x5d   :  { %1292 = vmatprep.mubr.bf16.mxu1 %v100_v17  ;;  %v2093_v17 = vld [vmem:[#allocation5 + $0x3d8] sm:$0xff]   ;;  %v2098_v22 = vld [vmem:[#allocation5 + $0x320] sm:$0xff]  }
  0x5e   :  { %1815 = vmatpush3.bf16.msra.mxu0 %v2022_v50  ;;  %v2074_v50 = vld [vmem:[#allocation5 + $0x230] sm:$0xff]   ;;  %v2095_v19 = vld [vmem:[#allocation5 + $0x398] sm:$0xff]  }
  0x5f   :  { %1837 = vmatpush3.bf16.msra.mxu1 %v2023_v51  ;;  %1816 = vmatprep.subr.bf16.mxu0 %v2024_v52  ;;  %v2075_v51 = vld [vmem:[#allocation5 + $0x2b0] sm:$0xff]   ;;  %v2076_v52 = vld [vmem:[#allocation5 + $0x278] sm:$0xff]  }
  0x60   :  { %1838 = vmatprep.subr.bf16.mxu1 %v2025_v53  ;;  %v2077_v53 = vld [vmem:[#allocation5 + $0x2f8] sm:$0xff]  }
  0x62   :  { %1817 = vmatpush3.bf16.msra.mxu0 %v2026_v54  ;;  %v2078_v54 = vld [vmem:[#allocation5 + $0x238] sm:$0xff]  }
  0x63   :  { %1839 = vmatpush3.bf16.msra.mxu1 %v2027_v55  ;;  %1818 = vmatprep.subr.bf16.mxu0 %v2028_v56  ;;  %v2079_v55 = vld [vmem:[#allocation5 + $0x2b8] sm:$0xff]   ;;  %v70_v56 = vld [vmem:[#allocation2 + $0x48] sm:$0xff] }
  0x64   :  { %1840 = vmatprep.subr.bf16.mxu1 %v2029_v57  ;;  %v86_v57 = vld [vmem:[#allocation2 + $0xc8] sm:$0xff] }
  0x66   :  { %1819 = vmatpush3.bf16.msra.mxu0 %v2030_v58  ;;  %v102_v58 = vpack.c.bf16 %v86_v57, %v70_v56  ;;  %v2119_v56 = vld [vmem:[#allocation7 + $0x38] sm:$0xff]   ;;  %v365_v57 = vlaneseq }
  0x67   :  { %1841 = vmatpush3.bf16.msra.mxu1 %v2031_v59  ;;  %1820 = vmatprep.subr.bf16.mxu0 %v2032_v60  ;;  %v72_v59 = vld [vmem:[#allocation2 + $0x58] sm:$0xff] }
  0x68   :  { %1842 = vmatprep.subr.bf16.mxu1 %v2033_v61  ;;  %v88_v60 = vld [vmem:[#allocation2 + $0xd8] sm:$0xff]  ;;  %v69_v61 = vld [vmem:[#allocation2 + $0x40] sm:$0xff] }
  0x6a   :  { %1821 = vmatpush3.bf16.msra.mxu0 %v2034_v62  ;;  %v104_v62 = vpack.c.bf16 %v88_v60, %v72_v59  ;;  %v2303_v60 = vld [vmem:[%s2329_s3] sm:$0xf]  ;;  %s2227_s3 = smov [#allocation8]  }
  0x6b   :  { %1843 = vmatpush3.bf16.msra.mxu1 %v2035_v63  ;;  %1822 = vmatprep.subr.bf16.mxu0 %v2036_v0  ;;  %v85_v63 = vld [vmem:[#allocation2 + $0xc0] sm:$0xff]  ;;  %v71_v0 = vld [vmem:[#allocation2 + $0x50] sm:$0xff]  ;;  %s1619_s26 = sshll.u32 %s2227_s3, 4  ;;  %s1620_s26 = int_to_ptr.vmem [resolvable:$true] %s1619_s26 }
  0x6c   :  { %1844 = vmatprep.subr.bf16.mxu1 %v2037_v1  ;;  %v87_v1 = vld [vmem:[#allocation2 + $0xd0] sm:$0xff]  ;;  %s2190_s29 = scalar_lea.vmem %s1620_s26, 256  ;;  %p2195_p11 = scmp.lt.s32.totalorder %s1620_s26, %s1620_s26 }
  0x6d   :  { %p2191_p10 = scmp.ne.s32.totalorder %s1620_s26, %s2190_s29  ;;  %p2196_p12 = scmp.lt.s32.totalorder %s2190_s29, %s2190_s29 }
  0x6e   :  { %1823 = vmatpush3.bf16.msra.mxu0 %v2038_v2  ;;  %v101_v2 = vpack.c.bf16 %v85_v63, %v69_v61 }
  0x6f   :  { %1845 = vmatpush3.bf16.msra.mxu1 %v2039_v3  ;;  %1824 = vmatprep.subr.bf16.mxu0 %v2040_v4  ;;  %v103_v3 = vpack.c.bf16 %v87_v1, %v71_v0  ;;  %v2080_v4 = vld [vmem:[#allocation5 + $0x340] sm:$0xff]   ;;  %p2197_p13 = por %p2196_p12, %p2195_p11 }
  0x70   :  { %1846 = vmatprep.subr.bf16.mxu1 %v2041_v5  ;;  %v2081_v5 = vld [vmem:[#allocation5 + $0x3c0] sm:$0xff]  }
  0x71   :  { %p2198_p0 = pnand %p2197_p13, %p2191_p10 }
  0x72   :  { %1825 = vmatpush3.bf16.msra.mxu0 %v2042_v6  ;;  %v2082_v6 = vld [vmem:[#allocation5 + $0x300] sm:$0xff]  }
  0x73   :  { %1847 = vmatpush3.bf16.msra.mxu1 %v2043_v7  ;;  %1826 = vmatprep.subr.bf16.mxu0 %v2044_v8  ;;  %v2083_v7 = vld [vmem:[#allocation5 + $0x380] sm:$0xff]   ;;  %v2084_v8 = vld [vmem:[#allocation5 + $0x348] sm:$0xff]  }
  0x74   :  { %1848 = vmatprep.subr.bf16.mxu1 %v2045_v9  ;;  %v2085_v9 = vld [vmem:[#allocation5 + $0x3c8] sm:$0xff]  }
  0x76   :  { %1827 = vmatpush3.bf16.msra.mxu0 %v2046_v10  ;;  %v2086_v10 = vld [vmem:[#allocation5 + $0x308] sm:$0xff]  }
  0x77   :  { %1849 = vmatpush3.bf16.msra.mxu1 %v2047_v11  ;;  %1856 = vmatprep.subr.bf16.mxu0 %v2048_v24  ;;  %v2087_v11 = vld [vmem:[#allocation5 + $0x388] sm:$0xff]  }
  0x78   :  { %1878 = vmatprep.subr.bf16.mxu1 %v2049_v25  ;;  %v2100_v24 = vld [vmem:[#allocation5 + $0x368] sm:$0xff]  }
  0x79   :  { %1252 = vmatmul.mubr.bf16.vlgmr.msra.gmra.mrb[4].mxu0 %v97_v21  ;;  %v2097_v21 = vld [vmem:[#allocation5 + $0x3e0] sm:$0xff]   ;;  %v2101_v25 = vld [vmem:[#allocation5 + $0x3e8] sm:$0xff]  }
  0x7a   :  { %1293 = vmatmul.mubr.bf16.vlgmr.msra.gmra.mrb[4].mxu1 %v99_v23  ;;  %1857 = vmatpush3.bf16.msra.mxu0 %v2050_v26  ;;  %v2099_v23 = vld [vmem:[#allocation5 + $0x3a0] sm:$0xff]   ;;  %v2102_v26 = vld [vmem:[#allocation5 + $0x328] sm:$0xff]  }
  0x7b   :  { %1879 = vmatpush3.bf16.msra.mxu1 %v2051_v27  ;;  %1858 = vmatprep.subr.bf16.mxu0 %v2052_v28  ;;  %v2103_v27 = vld [vmem:[#allocation5 + $0x3a8] sm:$0xff]   ;;  %v2104_v28 = vld [vmem:[#allocation5 + $0x370] sm:$0xff]  }
  0x7c   :  { %1880 = vmatprep.subr.bf16.mxu1 %v2053_v29  ;;  %1333 = vmatprep.mubr.bf16.mxu0 %v102_v58  ;;  %v2105_v29 = vld [vmem:[#allocation5 + $0x3f0] sm:$0xff]   ;;  %v2297_v58 = vshrl.u32 %v365_v57, 7 }
  0x7d   :  { %1374 = vmatprep.mubr.bf16.mxu1 %v104_v62 }
  0x7e   :  { %1859 = vmatpush3.bf16.msra.mxu0 %v2054_v30  ;;  %v2106_v30 = vld [vmem:[#allocation5 + $0x330] sm:$0xff]   ;;  %v367_v59 = vsub.s32 0, %v2297_v58 }
  0x7f   :  { %1881 = vmatpush3.bf16.msra.mxu1 %v2055_v31  ;;  %1860 = vmatprep.subr.bf16.mxu0 %v2056_v32  ;;  %v2107_v31 = vld [vmem:[#allocation5 + $0x3b0] sm:$0xff]   ;;  %v2108_v32 = vld [vmem:[#allocation5 + $0x378] sm:$0xff]  }
  0x80   :  { %1882 = vmatprep.subr.bf16.mxu1 %v2057_v33  ;;  %v2109_v33 = vld [vmem:[#allocation5 + $0x3f8] sm:$0xff]   ;;  %v368_v62 = vrot.slane %v2303_v60, %v367_v59 }
  0x82   :  { %1861 = vmatpush3.bf16.msra.mxu0 %v2058_v34  ;;  %v2110_v34 = vld [vmem:[#allocation5 + $0x338] sm:$0xff]  }
  0x83   :  { %1883 = vmatpush3.bf16.msra.mxu1 %v2059_v35  ;;  %1862 = vmatprep.subr.bf16.mxu0 %v2060_v36  ;;  %v2111_v35 = vld [vmem:[#allocation5 + $0x3b8] sm:$0xff]   ;;  %v74_v36 = vld [vmem:[#allocation2 + $0x68] sm:$0xff] }
  0x84   :  { %1884 = vmatprep.subr.bf16.mxu1 %v2061_v37  ;;  %v90_v37 = vld [vmem:[#allocation2 + $0xe8] sm:$0xff] }
  0x86   :  { %1863 = vmatpush3.bf16.msra.mxu0 %v2062_v38  ;;  %v76_v38 = vld [vmem:[#allocation2 + $0x78] sm:$0xff] }
  0x87   :  { %1885 = vmatpush3.bf16.msra.mxu1 %v2063_v39  ;;  %1864 = vmatprep.subr.bf16.mxu0 %v2064_v40  ;;  %v106_v39 = vpack.c.bf16 %v90_v37, %v74_v36  ;;  %v92_v40 = vld [vmem:[#allocation2 + $0xf8] sm:$0xff] }
  0x88   :  { %1886 = vmatprep.subr.bf16.mxu1 %v2065_v41  ;;  %v73_v41 = vld [vmem:[#allocation2 + $0x60] sm:$0xff] }
  0x8a   :  { %1865 = vmatpush3.bf16.msra.mxu0 %v2066_v42  ;;  %v89_v42 = vld [vmem:[#allocation2 + $0xe0] sm:$0xff] }
  0x8b   :  { %1887 = vmatpush3.bf16.msra.mxu1 %v2067_v43  ;;  %1866 = vmatprep.subr.bf16.mxu0 %v2068_v44  ;;  %v108_v43 = vpack.c.bf16 %v92_v40, %v76_v38  ;;  %v105_v44 = vpack.c.bf16 %v89_v42, %v73_v41 }
  0x8c   :  { %1888 = vmatprep.subr.bf16.mxu1 %v2069_v45  ;;  %v75_v45 = vld [vmem:[#allocation2 + $0x70] sm:$0xff] }
  0x8e   :  { %1867 = vmatpush3.bf16.msra.mxu0 %v2070_v46  ;;  %v91_v46 = vld [vmem:[#allocation2 + $0xf0] sm:$0xff] }
  0x8f   :  { %1889 = vmatpush3.bf16.msra.mxu1 %v2071_v47  ;;  %1868 = vmatprep.subr.bf16.mxu0 %v2072_v48  ;;  %v107_v47 = vpack.c.bf16 %v91_v46, %v75_v45  ;;  %v2112_v48 = vld [vmem:[#allocation7] sm:$0xff]  }
  0x90   :  { %1890 = vmatprep.subr.bf16.mxu1 %v2073_v49  ;;  %v2225_v49 = vmov 0.0  }
  0x92   :  { %1869 = vmatpush3.bf16.msra.mxu0 %v2074_v50  ;;  %v2113_v50 = vld [vmem:[#allocation7 + $0x8] sm:$0xff]  }
  0x93   :  { %1891 = vmatpush3.bf16.msra.mxu1 %v2075_v51  ;;  %1870 = vmatprep.subr.bf16.mxu0 %v2076_v52  ;;  %v2114_v51 = vld [vmem:[#allocation7 + $0x10] sm:$0xff]   ;;  %v2115_v52 = vld [vmem:[#allocation7 + $0x18] sm:$0xff]  }
  0x94   :  { %1892 = vmatprep.subr.bf16.mxu1 %v2077_v53  ;;  %v2116_v53 = vld [vmem:[#allocation7 + $0x20] sm:$0xff]  }
  0x96   :  { %1871 = vmatpush3.bf16.msra.mxu0 %v2078_v54  ;;  %v2117_v54 = vld [vmem:[#allocation7 + $0x28] sm:$0xff]  }
  0x97   :  { %1893 = vmatpush3.bf16.msra.mxu1 %v2079_v55  ;;  %1900 = vmatprep.subr.bf16.mxu0 %v2080_v4  ;;  %v2118_v55 = vld [vmem:[#allocation7 + $0x30] sm:$0xff]  }
  0x98   :  { %1922 = vmatprep.subr.bf16.mxu1 %v2081_v5 }
  0x99   :  { %1334 = vmatmul.mubr.bf16.vlgmr.msra.gmra.mrb[8].mxu0 %v101_v2 }
  0x9a   :  { %1375 = vmatmul.mubr.bf16.vlgmr.msra.gmra.mrb[8].mxu1 %v103_v3  ;;  %1901 = vmatpush3.bf16.msra.mxu0 %v2082_v6 }
  0x9b   :  { %1923 = vmatpush3.bf16.msra.mxu1 %v2083_v7  ;;  %1902 = vmatprep.subr.bf16.mxu0 %v2084_v8 }
  0x9c   :  { %1924 = vmatprep.subr.bf16.mxu1 %v2085_v9  ;;  %1415 = vmatprep.mubr.bf16.mxu0 %v106_v39 }
  0x9d   :  { %1456 = vmatprep.mubr.bf16.mxu1 %v108_v43 }
  0x9e   :  { %1903 = vmatpush3.bf16.msra.mxu0 %v2086_v10 }
  0x9f   :  { %1925 = vmatpush3.bf16.msra.mxu1 %v2087_v11  ;;  %1904 = vmatprep.subr.bf16.mxu0 %v2088_v12 }
  0xa0   :  { %1926 = vmatprep.subr.bf16.mxu1 %v2089_v13 }
  0xa2   :  { %1905 = vmatpush3.bf16.msra.mxu0 %v2090_v14 }
  0xa3   :  { %1927 = vmatpush3.bf16.msra.mxu1 %v2091_v15  ;;  %1906 = vmatprep.subr.bf16.mxu0 %v2092_v16 }
  0xa4   :  { %1928 = vmatprep.subr.bf16.mxu1 %v2093_v17 }
  0xa6   :  { %1907 = vmatpush3.bf16.msra.mxu0 %v2094_v18 }
  0xa7   :  { %1929 = vmatpush3.bf16.msra.mxu1 %v2095_v19  ;;  %1908 = vmatprep.subr.bf16.mxu0 %v2096_v20 }
  0xa8   :  { %1930 = vmatprep.subr.bf16.mxu1 %v2097_v21 }
  0xaa   :  { %1909 = vmatpush3.bf16.msra.mxu0 %v2098_v22 }
  0xab   :  { %1931 = vmatpush3.bf16.msra.mxu1 %v2099_v23  ;;  %1910 = vmatprep.subr.bf16.mxu0 %v2100_v24 }
  0xac   :  { %1932 = vmatprep.subr.bf16.mxu1 %v2101_v25 }
  0xae   :  { %1911 = vmatpush3.bf16.msra.mxu0 %v2102_v26 }
  0xaf   :  { %1933 = vmatpush3.bf16.msra.mxu1 %v2103_v27  ;;  %1912 = vmatprep.subr.bf16.mxu0 %v2104_v28 }
  0xb0   :  { %1934 = vmatprep.subr.bf16.mxu1 %v2105_v29 }
  0xb2   :  { %1913 = vmatpush3.bf16.msra.mxu0 %v2106_v30 }
  0xb3   :  { %1935 = vmatpush3.bf16.msra.mxu1 %v2107_v31  ;;  %1914 = vmatprep.subr.bf16.mxu0 %v2108_v32 }
  0xb4   :  { %1936 = vmatprep.subr.bf16.mxu1 %v2109_v33 }
  0xb6   :  { %1915 = vmatpush3.bf16.msra.mxu0 %v2110_v34 }
  0xb7   :  { %1937 = vmatpush3.bf16.msra.mxu1 %v2111_v35  ;;  %1953 = vmatprep.subr.bf16.mxu0 %v2225_v49 }
  0xb9   :  { %1416 = vmatmul.mubr.bf16.vlgmr.msra.gmra.mrb[12].mxu0 %v105_v44 }
  0xba   :  { %1457 = vmatmul.mubr.bf16.vlgmr.msra.gmra.mrb[12].mxu1 %v107_v47  ;;  %1954 = vmatpush3.bf16.msra.mxu0 %v2112_v48 }
  0xbb   :  { %1955 = vmatprep.subr.bf16.mxu0 %v2225_v49  ;;  %1969 = vmatprep.mubr.msk.bf16.mxu0 %vm2226_vm0, %v2225_v49 }
  0xbe   :  { %1956 = vmatpush3.bf16.msra.mxu0 %v2113_v50 }
  0xbf   :  { %1957 = vmatprep.subr.bf16.mxu0 %v2225_v49 }
  0xc2   :  { %1958 = vmatpush3.bf16.msra.mxu0 %v2114_v51 }
  0xc3   :  { %1959 = vmatprep.subr.bf16.mxu0 %v2225_v49 }
  0xc6   :  { %1960 = vmatpush3.bf16.msra.mxu0 %v2115_v52 }
  0xc7   :  { %1961 = vmatprep.subr.bf16.mxu0 %v2225_v49 }
  0xca   :  { %1962 = vmatpush3.bf16.msra.mxu0 %v2116_v53 }
  0xcb   :  { %1963 = vmatprep.subr.bf16.mxu0 %v2225_v49 }
  0xce   :  { %1964 = vmatpush3.bf16.msra.mxu0 %v2117_v54 }
  0xcf   :  { %1965 = vmatprep.subr.bf16.mxu0 %v2225_v49 }
  0xd2   :  { %1966 = vmatpush3.bf16.msra.mxu0 %v2118_v55 }
  0xd3   :  { %1967 = vmatprep.subr.bf16.mxu0 %v2225_v49 }
  0xd6   :  { %1968 = vmatpush3.bf16.msra.mxu0 %v2119_v56 }
 0x12c   :  { %v1784_v61 = vpop.f32.mrb[0].mxu0 }
 0x12d   :  { %v1806_v63 = vpop.f32.mrb[0].mxu1  ;;  %v1785_v0 = vpop.f32.mrb[1].mxu0 }
 0x12e   :  { %v1786_v1 = vadd.f32 %v1785_v0, %v1784_v61  ;;  %v1807_v2 = vpop.f32.mrb[1].mxu1  ;;  %v1787_v3 = vpop.f32.mrb[2].mxu0 }
 0x12f   :  { %v1808_v4 = vadd.f32 %v1807_v2, %v1806_v63  ;;  %v1809_v5 = vpop.f32.mrb[2].mxu1  ;;  %v1788_v6 = vpop.f32.mrb[3].mxu0 }
 0x130   :  { %v1172_v7 = vadd.f32 %v1786_v1, %v368_v62  ;;  %v1789_v8 = vadd.f32 %v1788_v6, %v1787_v3  ;;  %v1810_v9 = vpop.f32.mrb[3].mxu1  ;;  %v1486_v3 = vsub.s32 1, %v2297_v58 }
 0x131   :  { %v1811_v10 = vadd.f32 %v1810_v9, %v1809_v5 }
 0x132   :  { %v1213_v11 = vadd.f32 %v1808_v4, %v1172_v7  ;;  %v1175_v12 = vadd.f32 %v1789_v8, %v368_v62  ;;  %v1487_v4 = vrot.slane %v2303_v60, %v1486_v3 }
 0x134   :  { %v1216_v13 = vadd.f32 %v1811_v10, %v1175_v12 }
 0x14c   :  { %v1828_v14 = vpop.f32.mrb[4].mxu0 }
 0x14d   :  { %v1850_v15 = vpop.f32.mrb[4].mxu1  ;;  %v1829_v16 = vpop.f32.mrb[5].mxu0 }
 0x14e   :  { %v1830_v17 = vadd.f32 %v1829_v16, %v1828_v14  ;;  %v1851_v18 = vpop.f32.mrb[5].mxu1  ;;  %v1831_v19 = vpop.f32.mrb[6].mxu0 }
 0x14f   :  { %v1852_v20 = vadd.f32 %v1851_v18, %v1850_v15  ;;  %v1853_v21 = vpop.f32.mrb[6].mxu1  ;;  %v1832_v22 = vpop.f32.mrb[7].mxu0 }
 0x150   :  { %v1254_v23 = vadd.f32 %v1830_v17, %v1213_v11  ;;  %v1833_v24 = vadd.f32 %v1832_v22, %v1831_v19  ;;  %v1854_v25 = vpop.f32.mrb[7].mxu1 }
 0x151   :  { %v1855_v26 = vadd.f32 %v1854_v25, %v1853_v21  ;;  %v1602_v25 = vsub.s32 2, %v2297_v58 }
 0x152   :  { %v1295_v27 = vadd.f32 %v1852_v20, %v1254_v23  ;;  %v1257_v28 = vadd.f32 %v1833_v24, %v1216_v13 }
 0x154   :  { %v1298_v29 = vadd.f32 %v1855_v26, %v1257_v28  ;;  %v1608_v26 = vsub.s32 3, %v2297_v58 }
 0x16c   :  { %v1872_v30 = vpop.f32.mrb[8].mxu0 }
 0x16d   :  { %v1894_v31 = vpop.f32.mrb[8].mxu1  ;;  %v1873_v32 = vpop.f32.mrb[9].mxu0 }
 0x16e   :  { %v1895_v33 = vpop.f32.mrb[9].mxu1  ;;  %v1874_v34 = vadd.f32 %v1873_v32, %v1872_v30  ;;  %v1875_v36 = vpop.f32.mrb[10].mxu0  ;;  %v1609_v30 = vrot.slane %v2303_v60, %v1608_v26 }
 0x16f   :  { %v1896_v35 = vadd.f32 %v1895_v33, %v1894_v31  ;;  %v1897_v37 = vpop.f32.mrb[10].mxu1  ;;  %v1876_v38 = vpop.f32.mrb[11].mxu0 }
 0x170   :  { %v1898_v39 = vpop.f32.mrb[11].mxu1  ;;  %v1336_v40 = vadd.f32 %v1874_v34, %v1295_v27  ;;  %v1877_v41 = vadd.f32 %v1876_v38, %v1875_v36  ;;  %v1603_v27 = vrot.slane %v2303_v60, %v1602_v25 }
 0x171   :  { %v1899_v42 = vadd.f32 %v1898_v39, %v1897_v37 }
 0x172   :  { %v1377_v43 = vadd.f32 %v1896_v35, %v1336_v40  ;;  %v1339_v44 = vadd.f32 %v1877_v41, %v1298_v29 }
 0x174   :  { %v1380_v45 = vadd.f32 %v1899_v42, %v1339_v44 }
 0x18c   :  { %v1916_v46 = vpop.f32.mrb[12].mxu0 }
 0x18d   :  { %v1938_v47 = vpop.f32.mrb[12].mxu1  ;;  %v1917_v48 = vpop.f32.mrb[13].mxu0 }
 0x18e   :  { %v1918_v49 = vadd.f32 %v1917_v48, %v1916_v46  ;;  %v1939_v50 = vpop.f32.mrb[13].mxu1  ;;  %v1919_v51 = vpop.f32.mrb[14].mxu0 }
 0x18f   :  { %v1940_v52 = vadd.f32 %v1939_v50, %v1938_v47  ;;  %v1941_v53 = vpop.f32.mrb[14].mxu1  ;;  %v1920_v54 = vpop.f32.mrb[15].mxu0 }
 0x190   :  { %v1418_v55 = vadd.f32 %v1918_v49, %v1377_v43  ;;  %v1921_v56 = vadd.f32 %v1920_v54, %v1919_v51  ;;  %v1942_v57 = vpop.f32.mrb[15].mxu1 }
 0x191   :  { %v1943_v59 = vadd.f32 %v1942_v57, %v1941_v53 }
 0x192   :  { %v1459_v61 = vadd.f32 %v1940_v52, %v1418_v55  ;;  %v1421_v62 = vadd.f32 %v1921_v56, %v1380_v45 }
 0x194   :  { %v1462_v63 = vadd.f32 %v1943_v59, %v1421_v62  ;;  %v1465_v0 = vmax.f32 %v1459_v61, 0.0 }
 0x196   :  { %v1466_v1 = vmax.f32 %v1462_v63, 0.0 }
 0x198   :  { %v1467_v2 = vpack.c.bf16 %v1466_v1, %v1465_v0 }
 0x19a   :  { %1970 = vmatmul.mubr.bf16.vlgmr.msra.gmra.mrb[16].mxu0 %v1467_v2 }
 0x26d   :  { %v1570_v5 = vpop.f32.mrb[16].mxu0 }
 0x26e   :  { %v1571_v6 = vadd.f32 %v1570_v5, %v1487_v4  ;;  %v1971_v7 = vpop.f32.mrb[17].mxu0 }
 0x26f   :  { %v1573_v8 = vpop.f32.mrb[18].mxu0 }
 0x270   :  { %1577 = vadd.xlane.f32.xlu0 %v1571_v6  ;;  %v1972_v9 = vpop.f32.mrb[19].mxu0  ;;  %v1574_v10 = vadd.f32 %v1573_v8, %v1487_v4 }
 0x274   :  { %1579 = vadd.xlane.f32.xlu0 %v1574_v10 }
 0x2fd   :  { %v1578_v11 = vpop.xlane.xlu0 %1577 }
 0x2fe   :  { %v1582_v12 = vmul.f32 0.0078125, %v1578_v11 }
 0x300   :  { %v1584_v13 = vsub.f32 %v1571_v6, %v1582_v12 }
 0x301   :  { %v1580_v14 = vpop.xlane.xlu0 %1579 }
 0x302   :  { %v1583_v15 = vmul.f32 0.0078125, %v1580_v14  ;;  %v1586_v16 = vmul.f32 %v1584_v13, %v1584_v13 }
 0x304   :  { %v1585_v17 = vsub.f32 %v1574_v10, %v1583_v15  ;;  %1588 = vadd.xlane.f32.xlu1 %v1586_v16 }
 0x306   :  { %v1587_v18 = vmul.f32 %v1585_v17, %v1585_v17 }
 0x308   :  { %1590 = vadd.xlane.f32.xlu1 %v1587_v18 }
 0x391   :  { %v1589_v19 = vpop.xlane.xlu1 %1588 }
 0x392   :  { %v1592_v20 = vmul.f32 0.0078125, %v1589_v19 }
 0x394   :  { %v1594_v21 = vadd.f32 1e-12, %v1592_v20 }
 0x395   :  { %v1591_v22 = vpop.xlane.xlu1 %1590 }
 0x396   :  { %2120 = vrsqrt.f32 %v1594_v21  ;;  %v1593_v23 = vmul.f32 0.0078125, %v1591_v22 }
 0x398   :  { %v1595_v24 = vadd.f32 1e-12, %v1593_v23 }
 0x39a   :  { %2122 = vrsqrt.f32 %v1595_v24 }
 0x3a0   :  { %v2121_v28 = vpop.eup %2120 }
 0x3a1   :  { %v1598_v29 = vmul.f32 %v2121_v28, %v1584_v13 }
 0x3a3   :  { %v1604_v31 = vmul.f32 %v1603_v27, %v1598_v29 }
 0x3a4   :  { %v2123_v32 = vpop.eup %2122 }
 0x3a5   :  { %v1599_v33 = vmul.f32 %v2123_v32, %v1585_v17  ;;  %v1610_v34 = vadd.f32 %v1609_v30, %v1604_v31 }
 0x3a7   :  { %v1605_v35 = vmul.f32 %v1603_v27, %v1599_v33  ;;  %1612 = vst [vmem:[#allocation8] sm:$0xff] %v1610_v34 }
 0x3a9   :  { %v1611_v36 = vadd.f32 %v1609_v30, %v1605_v35 }
 0x3ab   :  { %1613 = vst [vmem:[#allocation8 + $0x8] sm:$0xff] %v1611_v36 }
 0x3ac   :  { %2201 = shalt.err (!%p2198_p0)
}
 0x3ad   :  { %s2202_s6 = scalar_lea.hbm %s2330_s4, 256 }
 0x3ae   :  { %p2203_p1 = scmp.ne.s32.totalorder %s2330_s4, %s2202_s6  ;;  %p2206_p2 = scmp.lt.u32.totalorder %s2202_s6, %s2330_s4 }
 0x3b0   :  { %p2208_p3 = pnand %p2206_p2, %p2203_p1 }
 0x3b2   :  { %2211 = shalt.err (!%p2208_p3)
}
 0x3b3   :  { %s2228_s11 = smov 8  }
 0x3b4   :  { %1625 = dma.vmem_to_hbm [thread:$0]  %s1620_s26, 256, %s2330_s4, [#allocation4], %s2223_s13, %s2223_s13, %s2228_s11  }
 0x3b5   :  { %2216 = dma.done.wait [#allocation4], 256  }
 0x3b6   :  { %2217 = vsyncadd [#allocation4], 4294967040 }
 0x3b7   :  { %1629 = vsyncpa [#allocation3], 1 }
 0x3b8   :  { %1630 = vsyncpa [#allocation6], 1 }
 0x3b9   :  { %1631 = vsyncpa [#allocation4], 1 }

</bundles_post_ra>
